<compile_context>
chip_gen: v5e
topology: v5e:2x2
jax: 0.10.0
libtpu: 0.0.40
codegen_flags: <defaults>
</compile_context>

<pallas_src>
import functools

import jax
import jax.numpy as jnp
from jax import lax
from jax.experimental import pallas as pl
from jax.experimental.pallas import tpu as pltpu

BN_EPS = 1e-5


def _round_up(x, m):
    return (x + m - 1) // m * m


# ----------------------------- Pallas kernel ------------------------------- #

def _conv_bn_kernel(p_ref, w_ref, g_ref, b_ref, o_ref, sum_ref, sumsq_ref, *,
                    m_true):
    """Fused im2col-matmul + training-mode BatchNorm.

    grid = (nc, 2, n_m): (C_out tile, phase, M tile)
      phase 0: accumulate per-channel sum / sum^2 of the conv output (no store).
      phase 1: recompute the conv tile and store y*scale + shift (lane-dense).
    """
    # All program_id reads at the top level (never inside pl.when closures).
    phase = pl.program_id(1)
    i = pl.program_id(2)
    is_first = i == 0

    # (tm, K) @ (K, tc) on the MXU: bf16 operands, f32 accumulation.
    y = jnp.dot(p_ref[...], w_ref[...], preferred_element_type=jnp.float32)

    @pl.when(jnp.logical_and(phase == 0, is_first))
    def _():
        sum_ref[...] = jnp.zeros_like(sum_ref)
        sumsq_ref[...] = jnp.zeros_like(sumsq_ref)

    @pl.when(phase == 0)
    def _():
        sum_ref[...] += jnp.sum(y, axis=0, keepdims=True)
        sumsq_ref[...] += jnp.sum(y * y, axis=0, keepdims=True)

    @pl.when(jnp.logical_and(phase == 1, is_first))
    def _():
        # Fold BN into a single FMA; computed once per C tile and cached in the
        # scratch refs (sum_ref <- scale, sumsq_ref <- shift).
        inv_m = jnp.float32(1.0 / m_true)
        mean = sum_ref[...] * inv_m                                # (1, tc)
        # TODO(synk): E[x^2]-E[x]^2 in f32 can cancel for very large M/|mean|;
        # a centered / compensated accumulation would be more robust.
        var = jnp.maximum(sumsq_ref[...] * inv_m - mean * mean, 0.0)
        scale = g_ref[...] * lax.rsqrt(var + jnp.float32(BN_EPS))
        shift = b_ref[...] - mean * scale
        sum_ref[...] = scale
        sumsq_ref[...] = shift

    @pl.when(phase == 1)
    def _():
        o_ref[...] = (y * sum_ref[...] + sumsq_ref[...]).astype(o_ref.dtype)


# ------------------------------ JAX glue code ------------------------------ #

def _im2col(x_pad, k_size, stride, dilation):
    """x_pad: (N, C, Hp, Wp) -> patches (N*Ho*Wo, C*k*k), plus (Ho, Wo)."""
    N, C, Hp, Wp = x_pad.shape
    Ho = (Hp - dilation * (k_size - 1) - 1) // stride + 1
    Wo = (Wp - dilation * (k_size - 1) - 1) // stride + 1
    cols = []
    for kh in range(k_size):
        for kw in range(k_size):
            h0 = kh * dilation
            w0 = kw * dilation
            sl = x_pad[:, :,
                       h0: h0 + (Ho - 1) * stride + 1: stride,
                       w0: w0 + (Wo - 1) * stride + 1: stride]
            cols.append(sl)  # (N, C, Ho, Wo)
    # (N, C, k*k, Ho, Wo) -> (N, Ho, Wo, C, k*k) -> (M, K); K order = (ci, kh, kw)
    patches = jnp.stack(cols, axis=2)
    patches = patches.transpose(0, 3, 4, 1, 2).reshape(
        N * Ho * Wo, C * k_size * k_size)
    return patches, Ho, Wo


@functools.partial(jax.jit,
                   static_argnames=("k_size", "stride", "padding", "dilation"))
def conv_block_forward(x, weight, gamma, beta, *, k_size, stride=1,
                       padding=None, dilation=1):
    """ConvBlock forward. x: (N, C_in, H, W) NCHW, weight: (C_out, C_in, k, k)."""
    # Same default rule as the PyTorch module (`padding or ...`).
    padding = padding or (dilation if dilation > 1 else k_size // 2)

    # bf16 before pad/im2col: halves the materialized patch intermediate and
    # removes a separate cast pass (MXU accumulates in f32 inside the kernel).
    x = x.astype(jnp.bfloat16)

    # ReflectionPad2d (glue, no compute).
    if padding:
        x = jnp.pad(x, ((0, 0), (0, 0), (padding, padding), (padding, padding)),
                    mode="reflect")

    N = x.shape[0]
    C_out = weight.shape[0]

    # TODO(synk): extract patches in-kernel from an H-tiled NHWC block with a
    # halo (pl.Element window / manual DMA) to remove the k^2 im2col expansion
    # of input HBM traffic entirely.
    patches, Ho, Wo = _im2col(x, k_size, stride, dilation)        # (M, K) bf16
    M, K = patches.shape

    # Lane-dense output-channel tiling: tc = 128 or 256 (full MXU width on
    # v6e/v7x when C_out allows); extra C tiles become a "parallel" grid axis.
    if C_out <= 256:
        C_pad = _round_up(C_out, 128)
        tc = C_pad
    else:
        C_pad = _round_up(C_out, 256)
        tc = 256
    nc = C_pad // tc

    w2d = weight.reshape(C_out, K).T                              # (K, C_out)
    w2d = jnp.pad(w2d, ((0, 0), (0, C_pad - C_out))).astype(jnp.bfloat16)
    gamma2d = jnp.pad(gamma.astype(jnp.float32), (0, C_pad - C_out)).reshape(1, C_pad)
    beta2d = jnp.pad(beta.astype(jnp.float32), (0, C_pad - C_out)).reshape(1, C_pad)

    # VMEM-budgeted M tile (multiple of 16 for bf16 sublane packing).  Budget
    # covers the double-buffered blocks and fits all of v5e / v6e / v7x.
    VMEM_BLOCK_BUDGET = 24 * 1024 * 1024
    fixed = 2 * K * tc * 2 + 6 * tc * 4          # weight (x2 bufs) + gamma/beta/scratch
    per_row = 2 * (K * 2) + 2 * (tc * 4)         # patches (bf16) + out (f32), x2 bufs
    tm = max(16, min(1024, (VMEM_BLOCK_BUDGET - fixed) // per_row,
                     _round_up(M, 16)))
    tm = (tm // 16) * 16

    M_pad = _round_up(M, tm)
    if M_pad != M:
        patches = jnp.pad(patches, ((0, M_pad - M), (0, 0)))      # zero rows: 0
    n_m = M_pad // tm

    vmem_limit = int(min(max(fixed + per_row * tm + (8 << 20), 32 << 20), 48 << 20))

    kernel = functools.partial(_conv_bn_kernel, m_true=float(M))

    # TODO(synk): pipeline_mode=pl.Buffered(1) on the constant-index weight /
    # gamma / beta specs (stop double-buffering invariant blocks, matters on
    # v7x) and Buffered(3) on patches in the small-K latency-bound regime.
    # TODO(synk): for very large K (deep channels) a store-and-reload phase-1
    # via input_output_aliases beats recomputing the matmul; not needed here.
    out = pl.pallas_call(
        kernel,
        out_shape=jax.ShapeDtypeStruct((M_pad, C_pad), jnp.float32),
        grid_spec=pltpu.PrefetchScalarGridSpec(
            num_scalar_prefetch=0,
            grid=(nc, 2, n_m),                     # (C tile, phase, M tile)
            in_specs=[
                pl.BlockSpec((tm, K), lambda c, p, i: (i, 0)),      # patches
                pl.BlockSpec((K, tc), lambda c, p, i: (0, c)),      # weight
                pl.BlockSpec((1, tc), lambda c, p, i: (0, c)),      # gamma
                pl.BlockSpec((1, tc), lambda c, p, i: (0, c)),      # beta
            ],
            # Pinned to block 0 during phase 0 so no un-normalized / garbage
            # block is ever written back; phase 1 writes each block once.
            out_specs=pl.BlockSpec((tm, tc), lambda c, p, i: (i * p, c)),
            scratch_shapes=[
                pltpu.VMEM((1, tc), jnp.float32),   # per-channel sum  -> scale
                pltpu.VMEM((1, tc), jnp.float32),   # per-channel sum2 -> shift
            ]),
        compiler_params=pltpu.CompilerParams(
            # C tiles are independent (per-channel BN) -> parallel (megacore on
            # v7x); phase + M tile carry the BN reduction -> arbitrary.
            dimension_semantics=("parallel", "arbitrary", "arbitrary"),
            vmem_limit_bytes=vmem_limit),
    )(patches, w2d, gamma2d, beta2d)

    out = out[:M, :C_out]

    # activation=None, drop_rate=None in the module defaults -> nothing more.
    # TODO(synk): BatchNorm running_mean/running_var momentum update is module
    # state, not part of the pure forward output; not implemented.
    # Back to NCHW f32 to match the PyTorch module's output layout/dtype.
    # TODO(synk): emit bf16 / stay NHWC when the downstream consumer allows it.
    out = out.reshape(N, Ho, Wo, C_out).transpose(0, 3, 1, 2)
    return out


# ---------------------------------- main ----------------------------------- #

if __name__ == "__main__":
    key = jax.random.PRNGKey(0)
    k_w, k_x = jax.random.split(key)

    # Small shapes consistent with the module: ConvBlock(in_ch=4, out_ch=8, k=3)
    N, C_in, H, W = 2, 4, 16, 16
    C_out, k_size = 8, 3

    x = jax.random.normal(k_x, (N, C_in, H, W), dtype=jnp.float32)
    fan_in = C_in * k_size * k_size
    weight = jax.random.normal(k_w, (C_out, C_in, k_size, k_size),
                               dtype=jnp.float32) * (1.0 / fan_in) ** 0.5
    gamma = jnp.ones((C_out,), dtype=jnp.float32)   # BN weight (PyTorch default)
    beta = jnp.zeros((C_out,), dtype=jnp.float32)   # BN bias  (PyTorch default)

    out = conv_block_forward(x, weight, gamma, beta, k_size=k_size,
                             stride=1, padding=None, dilation=1)
    jax.block_until_ready(out)
    assert out.shape == (N, C_out, H, W), out.shape
    assert bool(jnp.all(jnp.isfinite(out)))

    # Pure-JAX f32 reference (reflect pad -> conv -> training-mode BN).
    pad = k_size // 2
    x_ref = jnp.pad(x, ((0, 0), (0, 0), (pad, pad), (pad, pad)), mode="reflect")
    y_ref = lax.conv_general_dilated(
        x_ref, weight, (1, 1), "VALID",
        dimension_numbers=("NCHW", "OIHW", "NCHW"))
    mean = y_ref.mean(axis=(0, 2, 3), keepdims=True)
    var = y_ref.var(axis=(0, 2, 3), keepdims=True)
    ref = ((y_ref - mean) / jnp.sqrt(var + BN_EPS)
           * gamma.reshape(1, -1, 1, 1) + beta.reshape(1, -1, 1, 1))
    max_err = float(jnp.max(jnp.abs(out - ref)))
    assert max_err < 0.1, max_err   # loose: kernel feeds the MXU bf16 operands

    print("KERNEL_OK")
</pallas_src>

<mosaic_0001>
module attributes {stable_mosaic.version = 11 : i64} {
  func.func @_conv_bn_kernel(%arg0: i32, %arg1: i32, %arg2: i32, %arg3: memref<512x36xbf16, #tpu.memory_space<vmem>>, %arg4: memref<36x128xbf16, #tpu.memory_space<vmem>>, %arg5: memref<1x128xf32, #tpu.memory_space<vmem>>, %arg6: memref<1x128xf32, #tpu.memory_space<vmem>>, %arg7: memref<512x128xf32, #tpu.memory_space<vmem>>, %arg8: memref<1x128xf32, #tpu.memory_space<vmem>>, %arg9: memref<1x128xf32, #tpu.memory_space<vmem>>) attributes {dimension_semantics = [#tpu.dimension_semantics<parallel>, #tpu.dimension_semantics<arbitrary>, #tpu.dimension_semantics<arbitrary>], iteration_bounds = array<i64: 1, 2, 1>, scalar_prefetch = 0 : i64, scratch_operands = 2 : i64, tpu.core_type = #tpu.core_type<tc>, window_params = [{transform_indices = @transform_0, window_bounds = array<i64: 512, 36>}, {transform_indices = @transform_1, window_bounds = array<i64: 36, 128>}, {transform_indices = @transform_2, window_bounds = array<i64: 1, 128>}, {transform_indices = @transform_3, window_bounds = array<i64: 1, 128>}, {transform_indices = @transform_4, window_bounds = array<i64: 512, 128>}]} {
    %c0_i32 = arith.constant 0 : i32
    %0 = arith.cmpi eq, %arg2, %c0_i32 : i32
    %c0 = arith.constant 0 : index
    %c0_0 = arith.constant 0 : index
    %1 = vector.load %arg3[%c0, %c0_0] : memref<512x36xbf16, #tpu.memory_space<vmem>>, vector<512x36xbf16>
    %c0_1 = arith.constant 0 : index
    %c0_2 = arith.constant 0 : index
    %2 = vector.load %arg4[%c0_1, %c0_2] : memref<36x128xbf16, #tpu.memory_space<vmem>>, vector<36x128xbf16>
    %cst = arith.constant dense<0.000000e+00> : vector<512x128xf32>
    %3 = tpu.matmul %1, %2, %cst {dimension_numbers = #tpu.dot_dimension_numbers<[1], [0], [0], [1], [0, 0, 1, 1], [], []>} : vector<512x36xbf16>, vector<36x128xbf16>, vector<512x128xf32> -> vector<512x128xf32>
    %c0_i32_3 = arith.constant 0 : i32
    %4 = arith.cmpi eq, %arg1, %c0_i32_3 : i32
    %5 = arith.andi %4, %0 : i1
    %6 = arith.extui %5 : i1 to i32
    %c0_i32_4 = arith.constant 0 : i32
    %7 = arith.cmpi ne, %6, %c0_i32_4 : i32
    scf.if %7 {
      %cst_10 = arith.constant 0.000000e+00 : f32
      %18 = vector.broadcast %cst_10 : f32 to vector<1x128xf32>
      %c0_11 = arith.constant 0 : index
      %c0_12 = arith.constant 0 : index
      %19 = vector.load %arg8[%c0_11, %c0_12] : memref<1x128xf32, #tpu.memory_space<vmem>>, vector<1x128xf32>
      tpu.vector_store %arg8[%c0_11, %c0_12], %18 {strides = array<i32>} : memref<1x128xf32, #tpu.memory_space<vmem>>, vector<1x128xf32>,
      %cst_13 = arith.constant 0.000000e+00 : f32
      %20 = vector.broadcast %cst_13 : f32 to vector<1x128xf32>
      %c0_14 = arith.constant 0 : index
      %c0_15 = arith.constant 0 : index
      %21 = vector.load %arg9[%c0_14, %c0_15] : memref<1x128xf32, #tpu.memory_space<vmem>>, vector<1x128xf32>
      tpu.vector_store %arg9[%c0_14, %c0_15], %20 {strides = array<i32>} : memref<1x128xf32, #tpu.memory_space<vmem>>, vector<1x128xf32>,
    } else {
    }
    %c0_i32_5 = arith.constant 0 : i32
    %8 = arith.cmpi eq, %arg1, %c0_i32_5 : i32
    %9 = arith.extui %8 : i1 to i32
    %c0_i32_6 = arith.constant 0 : i32
    %10 = arith.cmpi ne, %9, %c0_i32_6 : i32
    scf.if %10 {
      %c0_10 = arith.constant 0 : index
      %c0_11 = arith.constant 0 : index
      %18 = vector.load %arg8[%c0_10, %c0_11] : memref<1x128xf32, #tpu.memory_space<vmem>>, vector<1x128xf32>
      %cst_12 = arith.constant dense<0.000000e+00> : vector<128xf32>
      %19 = vector.multi_reduction <add>, %3, %cst_12 [0] : vector<512x128xf32> to vector<128xf32>
      %20 = vector.shape_cast %19 : vector<128xf32> to vector<1x128xf32>
      %21 = arith.addf %18, %20 : vector<1x128xf32>
      %c0_13 = arith.constant 0 : index
      %c0_14 = arith.constant 0 : index
      %22 = vector.load %arg8[%c0_13, %c0_14] : memref<1x128xf32, #tpu.memory_space<vmem>>, vector<1x128xf32>
      tpu.vector_store %arg8[%c0_13, %c0_14], %21 {strides = array<i32>} : memref<1x128xf32, #tpu.memory_space<vmem>>, vector<1x128xf32>,
      %c0_15 = arith.constant 0 : index
      %c0_16 = arith.constant 0 : index
      %23 = vector.load %arg9[%c0_15, %c0_16] : memref<1x128xf32, #tpu.memory_space<vmem>>, vector<1x128xf32>
      %24 = arith.mulf %3, %3 : vector<512x128xf32>
      %cst_17 = arith.constant dense<0.000000e+00> : vector<128xf32>
      %25 = vector.multi_reduction <add>, %24, %cst_17 [0] : vector<512x128xf32> to vector<128xf32>
      %26 = vector.shape_cast %25 : vector<128xf32> to vector<1x128xf32>
      %27 = arith.addf %23, %26 : vector<1x128xf32>
      %c0_18 = arith.constant 0 : index
      %c0_19 = arith.constant 0 : index
      %28 = vector.load %arg9[%c0_18, %c0_19] : memref<1x128xf32, #tpu.memory_space<vmem>>, vector<1x128xf32>
      tpu.vector_store %arg9[%c0_18, %c0_19], %27 {strides = array<i32>} : memref<1x128xf32, #tpu.memory_space<vmem>>, vector<1x128xf32>,
    } else {
    }
    %c1_i32 = arith.constant 1 : i32
    %11 = arith.cmpi eq, %arg1, %c1_i32 : i32
    %12 = arith.andi %11, %0 : i1
    %13 = arith.extui %12 : i1 to i32
    %c0_i32_7 = arith.constant 0 : i32
    %14 = arith.cmpi ne, %13, %c0_i32_7 : i32
    scf.if %14 {
      %c0_10 = arith.constant 0 : index
      %c0_11 = arith.constant 0 : index
      %18 = vector.load %arg8[%c0_10, %c0_11] : memref<1x128xf32, #tpu.memory_space<vmem>>, vector<1x128xf32>
      %cst_12 = arith.constant 0.001953125 : f32
      %19 = vector.broadcast %cst_12 : f32 to vector<1x128xf32>
      %20 = arith.mulf %18, %19 : vector<1x128xf32>
      %c0_13 = arith.constant 0 : index
      %c0_14 = arith.constant 0 : index
      %21 = vector.load %arg9[%c0_13, %c0_14] : memref<1x128xf32, #tpu.memory_space<vmem>>, vector<1x128xf32>
      %cst_15 = arith.constant 0.001953125 : f32
      %22 = vector.broadcast %cst_15 : f32 to vector<1x128xf32>
      %23 = arith.mulf %21, %22 : vector<1x128xf32>
      %24 = arith.mulf %20, %20 : vector<1x128xf32>
      %25 = arith.subf %23, %24 : vector<1x128xf32>
      %cst_16 = arith.constant 0.000000e+00 : f32
      %26 = vector.broadcast %cst_16 : f32 to vector<1x128xf32>
      %27 = arith.maximumf %25, %26 : vector<1x128xf32>
      %c0_17 = arith.constant 0 : index
      %c0_18 = arith.constant 0 : index
      %28 = vector.load %arg5[%c0_17, %c0_18] : memref<1x128xf32, #tpu.memory_space<vmem>>, vector<1x128xf32>
      %cst_19 = arith.constant 9.99999974E-6 : f32
      %29 = vector.broadcast %cst_19 : f32 to vector<1x128xf32>
      %30 = arith.addf %27, %29 : vector<1x128xf32>
      %31 = math.rsqrt %30 : vector<1x128xf32>
      %32 = arith.mulf %28, %31 : vector<1x128xf32>
      %c0_20 = arith.constant 0 : index
      %c0_21 = arith.constant 0 : index
      %33 = vector.load %arg6[%c0_20, %c0_21] : memref<1x128xf32, #tpu.memory_space<vmem>>, vector<1x128xf32>
      %34 = arith.mulf %20, %32 : vector<1x128xf32>
      %35 = arith.subf %33, %34 : vector<1x128xf32>
      %c0_22 = arith.constant 0 : index
      %c0_23 = arith.constant 0 : index
      %36 = vector.load %arg8[%c0_22, %c0_23] : memref<1x128xf32, #tpu.memory_space<vmem>>, vector<1x128xf32>
      tpu.vector_store %arg8[%c0_22, %c0_23], %32 {strides = array<i32>} : memref<1x128xf32, #tpu.memory_space<vmem>>, vector<1x128xf32>,
      %c0_24 = arith.constant 0 : index
      %c0_25 = arith.constant 0 : index
      %37 = vector.load %arg9[%c0_24, %c0_25] : memref<1x128xf32, #tpu.memory_space<vmem>>, vector<1x128xf32>
      tpu.vector_store %arg9[%c0_24, %c0_25], %35 {strides = array<i32>} : memref<1x128xf32, #tpu.memory_space<vmem>>, vector<1x128xf32>,
    } else {
    }
    %c1_i32_8 = arith.constant 1 : i32
    %15 = arith.cmpi eq, %arg1, %c1_i32_8 : i32
    %16 = arith.extui %15 : i1 to i32
    %c0_i32_9 = arith.constant 0 : i32
    %17 = arith.cmpi ne, %16, %c0_i32_9 : i32
    scf.if %17 {
      %c0_10 = arith.constant 0 : index
      %c0_11 = arith.constant 0 : index
      %18 = vector.load %arg8[%c0_10, %c0_11] : memref<1x128xf32, #tpu.memory_space<vmem>>, vector<1x128xf32>
      %19 = vector.broadcast %18 : vector<1x128xf32> to vector<512x128xf32>
      %20 = arith.mulf %3, %19 : vector<512x128xf32>
      %c0_12 = arith.constant 0 : index
      %c0_13 = arith.constant 0 : index
      %21 = vector.load %arg9[%c0_12, %c0_13] : memref<1x128xf32, #tpu.memory_space<vmem>>, vector<1x128xf32>
      %22 = vector.broadcast %21 : vector<1x128xf32> to vector<512x128xf32>
      %23 = arith.addf %20, %22 : vector<512x128xf32>
      %c0_14 = arith.constant 0 : index
      %c0_15 = arith.constant 0 : index
      %24 = vector.load %arg7[%c0_14, %c0_15] : memref<512x128xf32, #tpu.memory_space<vmem>>, vector<512x128xf32>
      tpu.vector_store %arg7[%c0_14, %c0_15], %23 {strides = array<i32>} : memref<512x128xf32, #tpu.memory_space<vmem>>, vector<512x128xf32>,
    } else {
    }
    return
  }
  func.func @transform_0(%arg0: i32, %arg1: i32, %arg2: i32) -> (i32, i32) {
    %c0_i32 = arith.constant 0 : i32
    %c0_i32_0 = arith.constant 0 : i32
    return %arg2, %c0_i32 : i32, i32
  }
  func.func @transform_1(%arg0: i32, %arg1: i32, %arg2: i32) -> (i32, i32) {
    %c0_i32 = arith.constant 0 : i32
    %c0_i32_0 = arith.constant 0 : i32
    return %c0_i32, %arg0 : i32, i32
  }
  func.func @transform_2(%arg0: i32, %arg1: i32, %arg2: i32) -> (i32, i32) {
    %c0_i32 = arith.constant 0 : i32
    %c0_i32_0 = arith.constant 0 : i32
    return %c0_i32, %arg0 : i32, i32
  }
  func.func @transform_3(%arg0: i32, %arg1: i32, %arg2: i32) -> (i32, i32) {
    %c0_i32 = arith.constant 0 : i32
    %c0_i32_0 = arith.constant 0 : i32
    return %c0_i32, %arg0 : i32, i32
  }
  func.func @transform_4(%arg0: i32, %arg1: i32, %arg2: i32) -> (i32, i32) {
    %0 = arith.muli %arg2, %arg1 : i32
    %c0_i32 = arith.constant 0 : i32
    return %0, %arg0 : i32, i32
  }
}

</mosaic_0001>

<bundles_post_ra>
// kernel: conv_block_forward.1
= control target key start
LH: loop header
LB: loop body
LE: loop exit
PB: predicated region body
PF: predicated region fallthrough
CT: control target
= control target key end

     0   :  { %s1676_s15 = smov 0   ;;  %s1678_s16 = smov 0   ;;  %s2565_s0 = inlined_call_operand.vmem [shape: bf16[512,36], index: 0, kind: input, shape index: {}]   ;;  %s2566_s1 = inlined_call_operand.vmem [shape: bf16[36,128], index: 1, kind: input, shape index: {}]   ;;  %s2567_s2 = inlined_call_operand.vmem [shape: f32[1,128], index: 2, kind: input, shape index: {}]   ;;  %s2568_s3 = inlined_call_operand.vmem [shape: f32[1,128], index: 3, kind: input, shape index: {}]   ;;  %s2569_s4 = inlined_call_operand.vmem [shape: f32[512,128], index: 4, kind: output, shape index: {}]  }
   0x1   :  { %s1680_s17 = smov 0  }
   0x2 LB: > { %s29_s18 = sadd.s32 1, %s1644_s16  ;;  %p1375_p0 = scmp.ge.s32.totalorder %s1648_s17, 1  ;;  %s1648_s17 = sphi %s1680_s17, %s14_s17   ;;  %s1644_s16 = sphi %s1678_s16, %s2655_s16   ;;  %s1640_s15 = sphi %s1676_s15, %s2654_s15  }
   0x3   : > { %p31_p1 = scmp.ge.s32.totalorder %s29_s18, 2  ;;  %p211_p2 = scmp.lt.s32.totalorder %s1648_s17, 3 }
   0x5   : > { %s2657_s18 = smov (%p31_p1, %s29_s18), 0  ;;  %p212_p3 = pnand %p1375_p0, %p211_p2 }
   0x7   : > { %215 = sbr.rel (%p212_p3) target bundleno = 550 (0x226), region = 36 }
   0xc   : > { %v348_v0 = vld [vmem:[%s2566_s1 + $0x10] sm:$0x3]  ;;  %vm621_vm0 = vcmask 1041408   ;;  %v1585_v4 = vld [vmem:[%s2566_s1 + $0x8] sm:$0xff]  ;;  %v1584_v5 = vld [vmem:[%s2566_s1] sm:$0xff]  ;;  %vm524_vm1 = vcmask 293888  }
   0xd   : > { %v518_v1 = vunpack.c.l.b16 %v348_v0  ;;  %v1552_v6 = vld [vmem:[%s2565_s0] sm:$0xff]  ;;  %v1553_v10 = vld [vmem:[%s2565_s0 + $0x8] sm:$0xff]  ;;  %v1554_v14 = vld [vmem:[%s2565_s0 + $0x10] sm:$0xff]  ;;  %p794_p4 = scmp.eq.s32.totalorder %s1640_s15, 0 }
   0xe   : > { %v1560_v7 = vld [vmem:[%s2565_s0 + $0x40] sm:$0xff]  ;;  %v1561_v11 = vld [vmem:[%s2565_s0 + $0x48] sm:$0xff]  ;;  %v1562_v15 = vld [vmem:[%s2565_s0 + $0x50] sm:$0xff] }
   0xf   : > { %v521_v2 = vpack.c.b16 %v518_v1, %v518_v1  ;;  %v1568_v8 = vld [vmem:[%s2565_s0 + $0x80] sm:$0xff]  ;;  %v1569_v12 = vld [vmem:[%s2565_s0 + $0x88] sm:$0xff]  ;;  %v1570_v16 = vld [vmem:[%s2565_s0 + $0x90] sm:$0xff] }
  0x10   : > { %v1576_v9 = vld [vmem:[%s2565_s0 + $0xc0] sm:$0xff]  ;;  %v1577_v13 = vld [vmem:[%s2565_s0 + $0xc8] sm:$0xff]  ;;  %v1578_v17 = vld [vmem:[%s2565_s0 + $0xd0] sm:$0xff] }
  0x11   : > { %v623_v3 = vsel %vm621_vm0, %v521_v2, 0  ;;  %v1555_v18 = vld [vmem:[%s2565_s0 + $0x18] sm:$0xff]  ;;  %v1556_v22 = vld [vmem:[%s2565_s0 + $0x20] sm:$0xff]  ;;  %v1557_v26 = vld [vmem:[%s2565_s0 + $0x28] sm:$0xff] }
  0x12   : > { %630 = vmatpush.bf16.msra.mxu0 %v623_v3  ;;  %1588 = vmatpush.bf16.msra.mxu1 %v623_v3  ;;  %v1563_v19 = vld [vmem:[%s2565_s0 + $0x58] sm:$0xff]  ;;  %v1564_v23 = vld [vmem:[%s2565_s0 + $0x60] sm:$0xff]  ;;  %v1565_v27 = vld [vmem:[%s2565_s0 + $0x68] sm:$0xff] }
  0x13   : > { %1589 = vmatpush.bf16.msra.mxu2 %v623_v3  ;;  %1590 = vmatpush.bf16.msra.mxu3 %v623_v3  ;;  %v1571_v20 = vld [vmem:[%s2565_s0 + $0x98] sm:$0xff]  ;;  %v1572_v24 = vld [vmem:[%s2565_s0 + $0xa0] sm:$0xff]  ;;  %v1573_v28 = vld [vmem:[%s2565_s0 + $0xa8] sm:$0xff] }
  0x14   : > { %v1579_v21 = vld [vmem:[%s2565_s0 + $0xd8] sm:$0xff]  ;;  %v1580_v25 = vld [vmem:[%s2565_s0 + $0xe0] sm:$0xff]  ;;  %v1581_v29 = vld [vmem:[%s2565_s0 + $0xe8] sm:$0xff] }
  0x15   : > { %v1558_v30 = vld [vmem:[%s2565_s0 + $0x30] sm:$0xff]  ;;  %v1559_v34 = vld [vmem:[%s2565_s0 + $0x38] sm:$0xff] }
  0x16   : > { %631 = vmatpush.bf16.msra.mxu0 %v1585_v4  ;;  %1591 = vmatpush.bf16.msra.mxu1 %v1585_v4  ;;  %v1566_v31 = vld [vmem:[%s2565_s0 + $0x70] sm:$0xff]  ;;  %v1567_v35 = vld [vmem:[%s2565_s0 + $0x78] sm:$0xff] }
  0x17   : > { %1592 = vmatpush.bf16.msra.mxu2 %v1585_v4  ;;  %1593 = vmatpush.bf16.msra.mxu3 %v1585_v4  ;;  %v1574_v32 = vld [vmem:[%s2565_s0 + $0xb0] sm:$0xff]  ;;  %v1575_v36 = vld [vmem:[%s2565_s0 + $0xb8] sm:$0xff] }
  0x18   : > { %v1582_v33 = vld [vmem:[%s2565_s0 + $0xf0] sm:$0xff]  ;;  %v1583_v37 = vld [vmem:[%s2565_s0 + $0xf8] sm:$0xff] }
  0x1a   : > { %632 = vmatpush.bf16.msra.mxu0 %v1584_v5  ;;  %1594 = vmatpush.bf16.msra.mxu1 %v1584_v5 }
  0x1b   : > { %1595 = vmatpush.bf16.msra.mxu2 %v1584_v5  ;;  %1596 = vmatpush.bf16.msra.mxu3 %v1584_v5 }
  0x1d   : > { %1512 = vmatmul.msk.bf16.vlgmr.msra.gmra.mxu0 %vm524_vm1, %v1552_v6  ;;  %1520 = vmatmul.msk.bf16.vlgmr.msra.gmra.mxu1 %vm524_vm1, %v1560_v7 }
  0x1e   : > { %1528 = vmatmul.msk.bf16.vlgmr.msra.gmra.mxu2 %vm524_vm1, %v1568_v8  ;;  %1536 = vmatmul.msk.bf16.vlgmr.msra.gmra.mxu3 %vm524_vm1, %v1576_v9 }
  0x2d   : > { %1513 = vmatmul.msk.bf16.gmra.mxu0 %vm524_vm1, %v1553_v10  ;;  %1521 = vmatmul.msk.bf16.gmra.mxu1 %vm524_vm1, %v1561_v11 }
  0x2e   : > { %1529 = vmatmul.msk.bf16.gmra.mxu2 %vm524_vm1, %v1569_v12  ;;  %1537 = vmatmul.msk.bf16.gmra.mxu3 %vm524_vm1, %v1577_v13 }
  0x3d   : > { %1514 = vmatmul.msk.bf16.gmra.mxu0 %vm524_vm1, %v1554_v14  ;;  %1522 = vmatmul.msk.bf16.gmra.mxu1 %vm524_vm1, %v1562_v15 }
  0x3e   : > { %1530 = vmatmul.msk.bf16.gmra.mxu2 %vm524_vm1, %v1570_v16  ;;  %1538 = vmatmul.msk.bf16.gmra.mxu3 %vm524_vm1, %v1578_v17 }
  0x4d   : > { %1515 = vmatmul.msk.bf16.gmra.mxu0 %vm524_vm1, %v1555_v18  ;;  %1523 = vmatmul.msk.bf16.gmra.mxu1 %vm524_vm1, %v1563_v19 }
  0x4e   : > { %1531 = vmatmul.msk.bf16.gmra.mxu2 %vm524_vm1, %v1571_v20  ;;  %1539 = vmatmul.msk.bf16.gmra.mxu3 %vm524_vm1, %v1579_v21 }
  0x5d   : > { %1516 = vmatmul.msk.bf16.gmra.mxu0 %vm524_vm1, %v1556_v22  ;;  %1524 = vmatmul.msk.bf16.gmra.mxu1 %vm524_vm1, %v1564_v23 }
  0x5e   : > { %1532 = vmatmul.msk.bf16.gmra.mxu2 %vm524_vm1, %v1572_v24  ;;  %1540 = vmatmul.msk.bf16.gmra.mxu3 %vm524_vm1, %v1580_v25 }
  0x6d   : > { %1517 = vmatmul.msk.bf16.gmra.mxu0 %vm524_vm1, %v1557_v26  ;;  %1525 = vmatmul.msk.bf16.gmra.mxu1 %vm524_vm1, %v1565_v27 }
  0x6e   : > { %1533 = vmatmul.msk.bf16.gmra.mxu2 %vm524_vm1, %v1573_v28  ;;  %1541 = vmatmul.msk.bf16.gmra.mxu3 %vm524_vm1, %v1581_v29 }
  0x7d   : > { %1518 = vmatmul.msk.bf16.gmra.mxu0 %vm524_vm1, %v1558_v30  ;;  %1526 = vmatmul.msk.bf16.gmra.mxu1 %vm524_vm1, %v1566_v31 }
  0x7e   : > { %1534 = vmatmul.msk.bf16.gmra.mxu2 %vm524_vm1, %v1574_v32  ;;  %1542 = vmatmul.msk.bf16.gmra.mxu3 %vm524_vm1, %v1582_v33 }
  0x8d   : > { %1519 = vmatmul.msk.bf16.gmra.mxu0 %vm524_vm1, %v1559_v34  ;;  %1527 = vmatmul.msk.bf16.gmra.mxu1 %vm524_vm1, %v1567_v35 }
  0x8e   : > { %1535 = vmatmul.msk.bf16.gmra.mxu2 %vm524_vm1, %v1575_v36  ;;  %1543 = vmatmul.msk.bf16.gmra.mxu3 %vm524_vm1, %v1583_v37 }
  0x9a   : > { %v1834_v38 = vpop.f32.mrf.mxu0  ;;  %v1836_v39 = vpop.f32.mrf.mxu1 }
  0x9b   : > { %2594 = vst [vmem:[#allocation4_spill] sm:$0xff] %v1834_v38 }
  0xa1   : > { %v1838_v40 = vpop.f32.mrf.mxu2  ;;  %v1840_v41 = vpop.f32.mrf.mxu3 }
  0xa2   : > { %2595 = vst [vmem:[#allocation5_spill] sm:$0xff] %v1840_v41  ;;  %v1842_v42 = vpop.f32.mrf.mxu0  ;;  %v1844_v43 = vpop.f32.mrf.mxu1 }
  0xa3   : > { %2596 = vst [vmem:[#allocation6_spill] sm:$0xff] %v1842_v42 }
  0xa9   : > { %v1846_v44 = vpop.f32.mrf.mxu2  ;;  %v1848_v45 = vpop.f32.mrf.mxu3 }
  0xaa   : > { %2597 = vst [vmem:[#allocation7_spill] sm:$0xff] %v1848_v45  ;;  %v1850_v46 = vpop.f32.mrf.mxu0  ;;  %v1852_v47 = vpop.f32.mrf.mxu1 }
  0xab   : > { %2598 = vst [vmem:[#allocation8_spill] sm:$0xff] %v1850_v46 }
  0xb1   : > { %v1854_v48 = vpop.f32.mrf.mxu2  ;;  %v1856_v49 = vpop.f32.mrf.mxu3 }
  0xb2   : > { %2599 = vst [vmem:[#allocation9_spill] sm:$0xff] %v1856_v49  ;;  %v1858_v50 = vpop.f32.mrf.mxu0  ;;  %v1860_v51 = vpop.f32.mrf.mxu1 }
  0xb9   : > { %v1862_v52 = vpop.f32.mrf.mxu2  ;;  %v1864_v53 = vpop.f32.mrf.mxu3 }
  0xba   : > { %2600 = vst [vmem:[#allocation10_spill] sm:$0xff] %v1864_v53  ;;  %v1866_v54 = vpop.f32.mrf.mxu0  ;;  %v1868_v55 = vpop.f32.mrf.mxu1 }
  0xc1   : > { %v1870_v56 = vpop.f32.mrf.mxu2  ;;  %v1872_v57 = vpop.f32.mrf.mxu3 }
  0xc2   : > { %2601 = vst [vmem:[#allocation11_spill] sm:$0xff] %v1872_v57  ;;  %v1874_v58 = vpop.f32.mrf.mxu0  ;;  %v1876_v59 = vpop.f32.mrf.mxu1 }
  0xc9   : > { %v1878_v60 = vpop.f32.mrf.mxu2  ;;  %v1880_v61 = vpop.f32.mrf.mxu3 }
  0xca   : > { %2602 = vst [vmem:[#allocation12_spill] sm:$0xff] %v1880_v61  ;;  %v1882_v62 = vpop.f32.mrf.mxu0  ;;  %v1884_v63 = vpop.f32.mrf.mxu1 }
  0xd1   : > { %v1886_v0 = vpop.f32.mrf.mxu2  ;;  %v1888_v1 = vpop.f32.mrf.mxu3 }
  0xd2   : > { %2603 = vst [vmem:[#allocation13_spill] sm:$0xff] %v1888_v1  ;;  %v1890_v2 = vpop.f32.mrf.mxu0  ;;  %v1892_v3 = vpop.f32.mrf.mxu1 }
  0xd9   : > { %v1894_v4 = vpop.f32.mrf.mxu2  ;;  %v1896_v5 = vpop.f32.mrf.mxu3 }
  0xda   : > { %2604 = vst [vmem:[#allocation14_spill] sm:$0xff] %v1896_v5  ;;  %v1898_v6 = vpop.f32.mrf.mxu0  ;;  %v1900_v7 = vpop.f32.mrf.mxu1 }
  0xe1   : > { %v1902_v8 = vpop.f32.mrf.mxu2  ;;  %v1904_v9 = vpop.f32.mrf.mxu3 }
  0xe2   : > { %2605 = vst [vmem:[#allocation15_spill] sm:$0xff] %v1904_v9  ;;  %v1906_v10 = vpop.f32.mrf.mxu0  ;;  %v1908_v11 = vpop.f32.mrf.mxu1 }
  0xe9   : > { %v1910_v12 = vpop.f32.mrf.mxu2  ;;  %v1912_v13 = vpop.f32.mrf.mxu3 }
  0xea   : > { %2606 = vst [vmem:[#allocation16_spill] sm:$0xff] %v1912_v13  ;;  %v1914_v14 = vpop.f32.mrf.mxu0  ;;  %v1916_v15 = vpop.f32.mrf.mxu1 }
  0xf1   : > { %v1918_v16 = vpop.f32.mrf.mxu2  ;;  %v1920_v17 = vpop.f32.mrf.mxu3 }
  0xf2   : > { %2607 = vst [vmem:[#allocation17_spill] sm:$0xff] %v1920_v17  ;;  %v1922_v18 = vpop.f32.mrf.mxu0  ;;  %v1924_v19 = vpop.f32.mrf.mxu1 }
  0xf9   : > { %v1926_v20 = vpop.f32.mrf.mxu2  ;;  %v1928_v21 = vpop.f32.mrf.mxu3 }
  0xfa   : > { %2608 = vst [vmem:[#allocation18_spill] sm:$0xff] %v1926_v20  ;;  %v1930_v22 = vpop.f32.mrf.mxu0  ;;  %v1932_v23 = vpop.f32.mrf.mxu1 }
  0xfb   : > { %2609 = vst [vmem:[#allocation19_spill] sm:$0xff] %v1928_v21 }
 0x101   : > { %v1934_v24 = vpop.f32.mrf.mxu2  ;;  %v1936_v25 = vpop.f32.mrf.mxu3 }
 0x102   : > { %2610 = vst [vmem:[#allocation20_spill] sm:$0xff] %v1934_v24  ;;  %v1938_v26 = vpop.f32.mrf.mxu0  ;;  %v1940_v27 = vpop.f32.mrf.mxu1 }
 0x103   : > { %2611 = vst [vmem:[#allocation21_spill] sm:$0xff] %v1936_v25 }
 0x109   : > { %v1942_v28 = vpop.f32.mrf.mxu2  ;;  %v1944_v29 = vpop.f32.mrf.mxu3 }
 0x10a   : > { %2612 = vst [vmem:[#allocation22_spill] sm:$0xff] %v1942_v28  ;;  %v1946_v30 = vpop.f32.mrf.mxu0  ;;  %v1948_v31 = vpop.f32.mrf.mxu1 }
 0x10b   : > { %2613 = vst [vmem:[#allocation23_spill] sm:$0xff] %v1944_v29  ;;  %v1650_v29 = vmov (%p794_p4), 0.0  }
 0x10c   : > { %799 = vst [vmem:[#allocation2] sm:$0x1] (%p794_p4), %v1650_v29 }
 0x10d   : > { %800 = vst [vmem:[#allocation3] sm:$0x1] (%p794_p4), %v1650_v29 }
 0x111   : > { %v1950_v32 = vpop.f32.mrf.mxu2  ;;  %v1952_v33 = vpop.f32.mrf.mxu3 }
 0x112   : > { %2614 = vst [vmem:[#allocation24_spill] sm:$0xff] %v1950_v32  ;;  %v1954_v34 = vpop.f32.mrf.mxu0  ;;  %v1956_v35 = vpop.f32.mrf.mxu1 }
 0x113   : > { %2615 = vst [vmem:[#allocation25_spill] sm:$0xff] %v1952_v33 }
 0x117   : > { %798 = sbr.rel (!%p794_p4) target bundleno = 284 (0x11c), region = 40 }
 0x119   : > { %v1958_v36 = vpop.f32.mrf.mxu2  ;;  %v1960_v37 = vpop.f32.mrf.mxu3 }
 0x11a   : > { %2616 = vst [vmem:[#allocation26_spill] sm:$0xff] %v1958_v36 }
 0x11b   : > { %2617 = vst [vmem:[#allocation27_spill] sm:$0xff] %v1960_v37 }
 0x11c PF: > { %p1545_p5 = scmp.ne.s32.totalorder %s1640_s15, 0 }
 0x11e   : > { %803 = sbr.rel (%p1545_p5) target bundleno = 434 (0x1b2), region = 44 }
 0x123   : > { %v805_v33 = vadd.f32 %v1842_v42, %v1834_v38  ;;  %v877_v25 = vmul.f32 %v1834_v38, %v1834_v38  ;;  %v878_v21 = vmul.f32 %v1842_v42, %v1842_v42  ;;  %v879_v17 = vmul.f32 %v1850_v46, %v1850_v46 }
 0x124   : > { %v880_v13 = vmul.f32 %v1858_v50, %v1858_v50  ;;  %v881_v1 = vmul.f32 %v1866_v54, %v1866_v54 }
 0x125   : > { %v806_v37 = vadd.f32 %v805_v33, %v1850_v46  ;;  %v941_v9 = vadd.f32 %v878_v21, %v877_v25  ;;  %v882_v33 = vmul.f32 %v1874_v58, %v1874_v58  ;;  %v884_v25 = vmul.f32 %v1890_v2, %v1890_v2 }
 0x127   : > { %v807_v29 = vadd.f32 %v806_v37, %v1858_v50  ;;  %v942_v38 = vadd.f32 %v941_v9, %v879_v17  ;;  %v883_v37 = vmul.f32 %v1882_v62, %v1882_v62 }
 0x129   : > { %v808_v5 = vadd.f32 %v807_v29, %v1866_v54  ;;  %v943_v42 = vadd.f32 %v942_v38, %v880_v13 }
 0x12b   : > { %v809_v61 = vadd.f32 %v808_v5, %v1874_v58  ;;  %v944_v57 = vadd.f32 %v943_v42, %v881_v1  ;;  %v885_v5 = vmul.f32 %v1898_v6, %v1898_v6 }
 0x12d   : > { %v810_v46 = vadd.f32 %v809_v61, %v1882_v62  ;;  %v945_v29 = vadd.f32 %v944_v57, %v882_v33  ;;  %v886_v61 = vmul.f32 %v1906_v10, %v1906_v10  ;;  %v888_v33 = vmul.f32 %v1922_v18, %v1922_v18 }
 0x12f   : > { %v811_v21 = vadd.f32 %v810_v46, %v1890_v2  ;;  %v946_v17 = vadd.f32 %v945_v29, %v883_v37  ;;  %v887_v46 = vmul.f32 %v1914_v14, %v1914_v14  ;;  %v889_v29 = vmul.f32 %v1930_v22, %v1930_v22 }
 0x131   : > { %v812_v9 = vadd.f32 %v811_v21, %v1898_v6  ;;  %v947_v13 = vadd.f32 %v946_v17, %v884_v25  ;;  %v890_v17 = vmul.f32 %v1938_v26, %v1938_v26 }
 0x133   : > { %v813_v38 = vadd.f32 %v812_v9, %v1906_v10  ;;  %v948_v1 = vadd.f32 %v947_v13, %v885_v5  ;;  %v891_v13 = vmul.f32 %v1946_v30, %v1946_v30 }
 0x135   : > { %v814_v42 = vadd.f32 %v813_v38, %v1914_v14  ;;  %v949_v21 = vadd.f32 %v948_v1, %v886_v61  ;;  %v892_v1 = vmul.f32 %v1954_v34, %v1954_v34 }
 0x137   : > { %v815_v57 = vadd.f32 %v814_v42, %v1922_v18  ;;  %v950_v9 = vadd.f32 %v949_v21, %v887_v46  ;;  %v893_v21 = vmul.f32 %v1836_v39, %v1836_v39 }
 0x139   : > { %v816_v37 = vadd.f32 %v815_v57, %v1930_v22  ;;  %v951_v38 = vadd.f32 %v950_v9, %v888_v33  ;;  %v894_v9 = vmul.f32 %v1844_v43, %v1844_v43 }
 0x13b   : > { %v817_v25 = vadd.f32 %v816_v37, %v1938_v26  ;;  %v952_v42 = vadd.f32 %v951_v38, %v889_v29  ;;  %v895_v38 = vmul.f32 %v1852_v47, %v1852_v47 }
 0x13d   : > { %v818_v5 = vadd.f32 %v817_v25, %v1946_v30  ;;  %v953_v57 = vadd.f32 %v952_v42, %v890_v17  ;;  %v896_v42 = vmul.f32 %v1860_v51, %v1860_v51 }
 0x13f   : > { %v819_v61 = vadd.f32 %v818_v5, %v1954_v34  ;;  %v954_v37 = vadd.f32 %v953_v57, %v891_v13  ;;  %v897_v57 = vmul.f32 %v1868_v55, %v1868_v55 }
 0x141   : > { %v820_v46 = vadd.f32 %v819_v61, %v1836_v39  ;;  %v955_v25 = vadd.f32 %v954_v37, %v892_v1  ;;  %v898_v37 = vmul.f32 %v1876_v59, %v1876_v59 }
 0x143   : > { %v821_v33 = vadd.f32 %v820_v46, %v1844_v43  ;;  %v956_v5 = vadd.f32 %v955_v25, %v893_v21  ;;  %v899_v25 = vmul.f32 %v1884_v63, %v1884_v63 }
 0x145   : > { %v822_v29 = vadd.f32 %v821_v33, %v1852_v47  ;;  %v957_v61 = vadd.f32 %v956_v5, %v894_v9  ;;  %v900_v5 = vmul.f32 %v1892_v3, %v1892_v3 }
 0x147   : > { %v823_v17 = vadd.f32 %v822_v29, %v1860_v51  ;;  %v958_v46 = vadd.f32 %v957_v61, %v895_v38  ;;  %v901_v61 = vmul.f32 %v1900_v7, %v1900_v7 }
 0x149   : > { %v824_v13 = vadd.f32 %v823_v17, %v1868_v55  ;;  %v959_v33 = vadd.f32 %v958_v46, %v896_v42  ;;  %v902_v46 = vmul.f32 %v1908_v11, %v1908_v11 }
 0x14b   : > { %v825_v1 = vadd.f32 %v824_v13, %v1876_v59  ;;  %v960_v29 = vadd.f32 %v959_v33, %v897_v57  ;;  %v903_v33 = vmul.f32 %v1916_v15, %v1916_v15 }
 0x14d   : > { %v826_v21 = vadd.f32 %v825_v1, %v1884_v63  ;;  %v961_v17 = vadd.f32 %v960_v29, %v898_v37  ;;  %v904_v29 = vmul.f32 %v1924_v19, %v1924_v19 }
 0x14f   : > { %v827_v9 = vadd.f32 %v826_v21, %v1892_v3  ;;  %v962_v13 = vadd.f32 %v961_v17, %v899_v25  ;;  %v905_v17 = vmul.f32 %v1932_v23, %v1932_v23 }
 0x151   : > { %v828_v38 = vadd.f32 %v827_v9, %v1900_v7  ;;  %v963_v1 = vadd.f32 %v962_v13, %v900_v5  ;;  %v906_v13 = vmul.f32 %v1940_v27, %v1940_v27 }
 0x153   : > { %v829_v42 = vadd.f32 %v828_v38, %v1908_v11  ;;  %v964_v21 = vadd.f32 %v963_v1, %v901_v61  ;;  %v907_v1 = vmul.f32 %v1948_v31, %v1948_v31 }
 0x155   : > { %v830_v57 = vadd.f32 %v829_v42, %v1916_v15  ;;  %v965_v9 = vadd.f32 %v964_v21, %v902_v46  ;;  %v908_v21 = vmul.f32 %v1956_v35, %v1956_v35 }
 0x157   : > { %v831_v37 = vadd.f32 %v830_v57, %v1924_v19  ;;  %v966_v38 = vadd.f32 %v965_v9, %v903_v33  ;;  %v909_v9 = vmul.f32 %v1838_v40, %v1838_v40 }
 0x159   : > { %v832_v25 = vadd.f32 %v831_v37, %v1932_v23  ;;  %v967_v42 = vadd.f32 %v966_v38, %v904_v29  ;;  %v910_v38 = vmul.f32 %v1846_v44, %v1846_v44 }
 0x15b   : > { %v833_v5 = vadd.f32 %v832_v25, %v1940_v27  ;;  %v968_v57 = vadd.f32 %v967_v42, %v905_v17  ;;  %v911_v42 = vmul.f32 %v1854_v48, %v1854_v48 }
 0x15d   : > { %v834_v61 = vadd.f32 %v833_v5, %v1948_v31  ;;  %v969_v37 = vadd.f32 %v968_v57, %v906_v13  ;;  %v912_v57 = vmul.f32 %v1862_v52, %v1862_v52 }
 0x15f   : > { %v835_v46 = vadd.f32 %v834_v61, %v1956_v35  ;;  %v970_v25 = vadd.f32 %v969_v37, %v907_v1  ;;  %v913_v37 = vmul.f32 %v1870_v56, %v1870_v56 }
 0x161   : > { %v836_v33 = vadd.f32 %v835_v46, %v1838_v40  ;;  %v971_v5 = vadd.f32 %v970_v25, %v908_v21  ;;  %v914_v25 = vmul.f32 %v1878_v60, %v1878_v60 }
 0x163   : > { %v837_v29 = vadd.f32 %v836_v33, %v1846_v44  ;;  %v972_v61 = vadd.f32 %v971_v5, %v909_v9  ;;  %v915_v5 = vmul.f32 %v1886_v0, %v1886_v0 }
 0x165   : > { %v838_v17 = vadd.f32 %v837_v29, %v1854_v48  ;;  %v973_v46 = vadd.f32 %v972_v61, %v910_v38  ;;  %v916_v61 = vmul.f32 %v1894_v4, %v1894_v4 }
 0x167   : > { %v839_v13 = vadd.f32 %v838_v17, %v1862_v52  ;;  %v974_v33 = vadd.f32 %v973_v46, %v911_v42  ;;  %v917_v46 = vmul.f32 %v1902_v8, %v1902_v8 }
 0x169   : > { %v840_v1 = vadd.f32 %v839_v13, %v1870_v56  ;;  %v975_v29 = vadd.f32 %v974_v33, %v912_v57  ;;  %v918_v33 = vmul.f32 %v1910_v12, %v1910_v12 }
 0x16b   : > { %v841_v21 = vadd.f32 %v840_v1, %v1878_v60  ;;  %v976_v17 = vadd.f32 %v975_v29, %v913_v37  ;;  %v919_v29 = vmul.f32 %v1918_v16, %v1918_v16 }
 0x16d   : > { %v842_v9 = vadd.f32 %v841_v21, %v1886_v0  ;;  %v977_v13 = vadd.f32 %v976_v17, %v914_v25  ;;  %v920_v17 = vmul.f32 %v1926_v20, %v1926_v20 }
 0x16f   : > { %v843_v38 = vadd.f32 %v842_v9, %v1894_v4  ;;  %v978_v1 = vadd.f32 %v977_v13, %v915_v5  ;;  %v921_v13 = vmul.f32 %v1934_v24, %v1934_v24 }
 0x171   : > { %v844_v42 = vadd.f32 %v843_v38, %v1902_v8  ;;  %v979_v21 = vadd.f32 %v978_v1, %v916_v61  ;;  %v922_v1 = vmul.f32 %v1942_v28, %v1942_v28 }
 0x173   : > { %v845_v57 = vadd.f32 %v844_v42, %v1910_v12  ;;  %v980_v9 = vadd.f32 %v979_v21, %v917_v46  ;;  %v923_v21 = vmul.f32 %v1950_v32, %v1950_v32 }
 0x175   : > { %v846_v37 = vadd.f32 %v845_v57, %v1918_v16  ;;  %v981_v38 = vadd.f32 %v980_v9, %v918_v33  ;;  %v924_v9 = vmul.f32 %v1958_v36, %v1958_v36 }
 0x177   : > { %v847_v25 = vadd.f32 %v846_v37, %v1926_v20  ;;  %v982_v42 = vadd.f32 %v981_v38, %v919_v29  ;;  %v925_v38 = vmul.f32 %v1840_v41, %v1840_v41 }
 0x179   : > { %v848_v5 = vadd.f32 %v847_v25, %v1934_v24  ;;  %v983_v57 = vadd.f32 %v982_v42, %v920_v17  ;;  %v926_v42 = vmul.f32 %v1848_v45, %v1848_v45 }
 0x17b   : > { %v849_v61 = vadd.f32 %v848_v5, %v1942_v28  ;;  %v984_v37 = vadd.f32 %v983_v57, %v921_v13  ;;  %v927_v57 = vmul.f32 %v1856_v49, %v1856_v49 }
 0x17d   : > { %v850_v46 = vadd.f32 %v849_v61, %v1950_v32  ;;  %v985_v25 = vadd.f32 %v984_v37, %v922_v1  ;;  %v928_v37 = vmul.f32 %v1864_v53, %v1864_v53 }
 0x17f   : > { %v851_v33 = vadd.f32 %v850_v46, %v1958_v36  ;;  %v986_v5 = vadd.f32 %v985_v25, %v923_v21 }
 0x181   : > { %v852_v29 = vadd.f32 %v851_v33, %v1840_v41  ;;  %v987_v61 = vadd.f32 %v986_v5, %v924_v9  ;;  %v2618_v41 = vld [vmem:[#allocation11_spill] sm:$0xff] }
 0x182   : > { %v929_v25 = vmul.f32 %v2618_v41, %v2618_v41 }
 0x183   : > { %v853_v17 = vadd.f32 %v852_v29, %v1848_v45  ;;  %v988_v46 = vadd.f32 %v987_v61, %v925_v38  ;;  %v2619_v45 = vld [vmem:[#allocation12_spill] sm:$0xff] }
 0x184   : > { %v930_v5 = vmul.f32 %v2619_v45, %v2619_v45 }
 0x185   : > { %v854_v13 = vadd.f32 %v853_v17, %v1856_v49  ;;  %v989_v33 = vadd.f32 %v988_v46, %v926_v42  ;;  %v2620_v49 = vld [vmem:[#allocation13_spill] sm:$0xff] }
 0x186   : > { %v931_v61 = vmul.f32 %v2620_v49, %v2620_v49 }
 0x187   : > { %v855_v1 = vadd.f32 %v854_v13, %v1864_v53  ;;  %v990_v29 = vadd.f32 %v989_v33, %v927_v57  ;;  %v2621_v53 = vld [vmem:[#allocation14_spill] sm:$0xff] }
 0x188   : > { %v932_v46 = vmul.f32 %v2621_v53, %v2621_v53 }
 0x189   : > { %v856_v21 = vadd.f32 %v855_v1, %v2618_v41  ;;  %v991_v17 = vadd.f32 %v990_v29, %v928_v37  ;;  %v2622_v41 = vld [vmem:[#allocation15_spill] sm:$0xff] }
 0x18a   : > { %v933_v33 = vmul.f32 %v2622_v41, %v2622_v41 }
 0x18b   : > { %v857_v9 = vadd.f32 %v856_v21, %v2619_v45  ;;  %v992_v13 = vadd.f32 %v991_v17, %v929_v25  ;;  %v2623_v45 = vld [vmem:[#allocation16_spill] sm:$0xff] }
 0x18c   : > { %v934_v29 = vmul.f32 %v2623_v45, %v2623_v45 }
 0x18d   : > { %v858_v38 = vadd.f32 %v857_v9, %v2620_v49  ;;  %v993_v1 = vadd.f32 %v992_v13, %v930_v5  ;;  %v2624_v49 = vld [vmem:[#allocation17_spill] sm:$0xff] }
 0x18e   : > { %v935_v17 = vmul.f32 %v2624_v49, %v2624_v49 }
 0x18f   : > { %v859_v42 = vadd.f32 %v858_v38, %v2621_v53  ;;  %v994_v21 = vadd.f32 %v993_v1, %v931_v61  ;;  %v2625_v53 = vld [vmem:[#allocation19_spill] sm:$0xff] }
 0x190   : > { %v936_v13 = vmul.f32 %v2625_v53, %v2625_v53 }
 0x191   : > { %v860_v57 = vadd.f32 %v859_v42, %v2622_v41  ;;  %v995_v9 = vadd.f32 %v994_v21, %v932_v46  ;;  %v2626_v41 = vld [vmem:[#allocation21_spill] sm:$0xff] }
 0x192   : > { %v937_v1 = vmul.f32 %v2626_v41, %v2626_v41 }
 0x193   : > { %v861_v37 = vadd.f32 %v860_v57, %v2623_v45  ;;  %v996_v38 = vadd.f32 %v995_v9, %v933_v33  ;;  %v2627_v45 = vld [vmem:[#allocation23_spill] sm:$0xff] }
 0x194   : > { %v938_v21 = vmul.f32 %v2627_v45, %v2627_v45 }
 0x195   : > { %v862_v25 = vadd.f32 %v861_v37, %v2624_v49  ;;  %v997_v42 = vadd.f32 %v996_v38, %v934_v29  ;;  %v2628_v49 = vld [vmem:[#allocation25_spill] sm:$0xff] }
 0x196   : > { %v939_v9 = vmul.f32 %v2628_v49, %v2628_v49 }
 0x197   : > { %v863_v5 = vadd.f32 %v862_v25, %v2625_v53  ;;  %v998_v57 = vadd.f32 %v997_v42, %v935_v17  ;;  %v2629_v53 = vld [vmem:[#allocation27_spill] sm:$0xff] }
 0x198   : > { %v940_v38 = vmul.f32 %v2629_v53, %v2629_v53 }
 0x199   : > { %v864_v61 = vadd.f32 %v863_v5, %v2626_v41  ;;  %v999_v37 = vadd.f32 %v998_v57, %v936_v13 }
 0x19b   : > { %v865_v46 = vadd.f32 %v864_v61, %v2627_v45  ;;  %v1000_v25 = vadd.f32 %v999_v37, %v937_v1 }
 0x19d   : > { %v866_v33 = vadd.f32 %v865_v46, %v2628_v49  ;;  %v1001_v5 = vadd.f32 %v1000_v25, %v938_v21  ;;  %v804_v46 = vld [vmem:[#allocation2] sm:$0x1] }
 0x19f   : > { %v867_v29 = vadd.f32 %v866_v33, %v2629_v53  ;;  %v1002_v17 = vadd.f32 %v1001_v5, %v939_v9  ;;  %v876_v33 = vld [vmem:[#allocation3] sm:$0x1] }
 0x1a1   : > { %v868_v41 = vrot.slane %v867_v29, 4  ;;  %v1003_v61 = vadd.f32 %v1002_v17, %v940_v38 }
 0x1a3   : > { %v869_v42 = vadd.f32 %v868_v41, %v867_v29  ;;  %v1004_v32 = vrot.slane %v1003_v61, 4 }
 0x1a5   : > { %v870_v36 = vrot.slane %v869_v42, 2  ;;  %v1005_v13 = vadd.f32 %v1004_v32, %v1003_v61 }
 0x1a7   : > { %v871_v45 = vadd.f32 %v870_v36, %v869_v42  ;;  %v1006_v28 = vrot.slane %v1005_v13, 2 }
 0x1a9   : > { %v872_v57 = vrot.slane %v871_v45, 1  ;;  %v1007_v49 = vadd.f32 %v1006_v28, %v1005_v13 }
 0x1ab   : > { %v873_v24 = vadd.f32 %v872_v57, %v871_v45  ;;  %v1008_v37 = vrot.slane %v1007_v49, 1 }
 0x1ad   : > { %v874_v1 = vadd.f32 %v873_v24, %v804_v46  ;;  %v1009_v20 = vadd.f32 %v1008_v37, %v1007_v49 }
 0x1af   : > { %875 = vst [vmem:[#allocation2] sm:$0x1] %v874_v1  ;;  %v1010_v53 = vadd.f32 %v1009_v20, %v876_v33 }
 0x1b1   : > { %1011 = vst [vmem:[#allocation3] sm:$0x1] %v1010_v53 }
 0x1b2 PF: > { %p1012_p6 = scmp.eq.s32.totalorder %s1640_s15, 1 }
 0x1b3   : > { %v1024_v42 = vld [vmem:[%s2567_s2] sm:$0x1] (%p1012_p6) }
 0x1b4   : > { %1016 = sbr.rel (!%p1012_p6) target bundleno = 474 (0x1da), region = 48  ;;  %v1037_v57 = vld [vmem:[%s2568_s3] sm:$0x1] (%p1012_p6) }
 0x1b6   : > { %v1017_v21 = vld [vmem:[#allocation2] sm:$0x1] (%p1012_p6) }
 0x1b7   : > { %v1018_v36 = vmul.f32 (%p1012_p6), 0.001953125, %v1017_v21 }
 0x1b8   : > { %v1019_v9 = vld [vmem:[#allocation3] sm:$0x1] (%p1012_p6) }
 0x1b9   : > { %v1020_v32 = vmul.f32 0.001953125, %v1019_v9  ;;  %v1021_v25 = vmul.f32 %v1018_v36, %v1018_v36 }
 0x1bb   : > { %v1022_v29 = vsub.f32 %v1020_v32, %v1021_v25 }
 0x1bd   : > { %v1023_v38 = vmax.f32 %v1022_v29, 0.0 }
 0x1bf   : > { %v1025_v5 = vadd.f32 1e-05, %v1023_v38 }
 0x1c1   : > { %1622 = vrsqrt.f32 %v1025_v5  ;;  %vm1032_vm2 = vweird.f32 %v1025_v5 }
 0x1c7   : > { %v1623_v24 = vpop.eup %1622 }
 0x1c8   : > { %v1027_v28 = vmul.f32 %v1623_v24, %v1025_v5  ;;  %vm1033_vm3 = vweird.f32 %v1623_v24 }
 0x1c9   : > { %vm1034_vm4 = vmor %vm1032_vm2, %vm1033_vm3 }
 0x1ca   : > { %v1028_v41 = vmul.f32 %v1623_v24, %v1027_v28 }
 0x1cc   : > { %v1029_v17 = vmul.f32 0.5, %v1028_v41 }
 0x1ce   : > { %v1030_v20 = vsub.f32 1.5, %v1029_v17 }
 0x1d0   : > { %v1031_v61 = vmul.f32 %v1623_v24, %v1030_v20 }
 0x1d2   : > { %v1035_v45 = vsel %vm1034_vm4, %v1623_v24, %v1031_v61 }
 0x1d3   : > { %v1036_v13 = vmul.f32 %v1035_v45, %v1024_v42 }
 0x1d5   : > { %1040 = vst [vmem:[#allocation2] sm:$0x1] %v1036_v13  ;;  %v1038_v46 = vmul.f32 %v1036_v13, %v1018_v36 }
 0x1d7   : > { %v1039_v49 = vsub.f32 %v1037_v57, %v1038_v46 }
 0x1d9   : > { %1041 = vst [vmem:[#allocation3] sm:$0x1] %v1039_v49 }
 0x1da PF: > { %p1547_p7 = scmp.ne.s32.totalorder %s1640_s15, 1 }
 0x1dc   : > { %1044 = sbr.rel (%p1547_p7) target bundleno = 550 (0x226), region = 52 }
 0x1e1   : > { %v2165_v1 = vld [vmem:[#allocation2] ss:$0 sm:$0xff]  ;;  %v2167_v37 = vld [vmem:[#allocation3] ss:$0 sm:$0xff]  ;;  %v2630_v33 = vld [vmem:[#allocation4_spill] sm:$0xff] }
 0x1e2   : > { %v1049_v53 = vmul.f32 %v2165_v1, %v2630_v33  ;;  %v2631_v21 = vld [vmem:[#allocation6_spill] sm:$0xff]  ;;  %v2632_v32 = vld [vmem:[#allocation8_spill] sm:$0xff]  ;;  %v1052_v36 = vmul.f32 %v2165_v1, %v1858_v50  ;;  %v1053_v29 = vmul.f32 %v2165_v1, %v1866_v54  ;;  %v1054_v38 = vmul.f32 %v2165_v1, %v1874_v58 }
 0x1e3   : > { %v1050_v9 = vmul.f32 %v2165_v1, %v2631_v21  ;;  %v1051_v25 = vmul.f32 %v2165_v1, %v2632_v32  ;;  %v1055_v41 = vmul.f32 %v2165_v1, %v1882_v62  ;;  %v1056_v50 = vmul.f32 %v2165_v1, %v1890_v2 }
 0x1e4   : > { %v1117_v5 = vadd.f32 %v2167_v37, %v1049_v53  ;;  %v1120_v17 = vadd.f32 %v2167_v37, %v1052_v36  ;;  %v1121_v54 = vadd.f32 %v2167_v37, %v1053_v29  ;;  %v1057_v58 = vmul.f32 %v2165_v1, %v1898_v6 }
 0x1e5   : > { %v1118_v24 = vadd.f32 %v2167_v37, %v1050_v9  ;;  %v1119_v28 = vadd.f32 %v2167_v37, %v1051_v25  ;;  %v1122_v62 = vadd.f32 %v2167_v37, %v1054_v38  ;;  %v1058_v20 = vmul.f32 %v2165_v1, %v1906_v10 }
 0x1e6   : > { %1181 = vst [vmem:[%s2569_s4] sm:$0xff] %v1117_v5  ;;  %v1123_v2 = vadd.f32 %v2167_v37, %v1055_v41  ;;  %v1059_v42 = vmul.f32 %v2165_v1, %v1914_v14  ;;  %v1124_v6 = vadd.f32 %v2167_v37, %v1056_v50  ;;  %v1060_v61 = vmul.f32 %v2165_v1, %v1922_v18 }
 0x1e7   : > { %1182 = vst [vmem:[%s2569_s4 + $0x8] sm:$0xff] %v1118_v24  ;;  %v1125_v10 = vadd.f32 %v2167_v37, %v1057_v58  ;;  %v1061_v45 = vmul.f32 %v2165_v1, %v1930_v22  ;;  %v1126_v14 = vadd.f32 %v2167_v37, %v1058_v20  ;;  %v1062_v13 = vmul.f32 %v2165_v1, %v1938_v26 }
 0x1e8   : > { %1183 = vst [vmem:[%s2569_s4 + $0x10] sm:$0xff] %v1119_v28  ;;  %v1127_v18 = vadd.f32 %v2167_v37, %v1059_v42  ;;  %v1063_v57 = vmul.f32 %v2165_v1, %v1946_v30  ;;  %v1128_v22 = vadd.f32 %v2167_v37, %v1060_v61  ;;  %v1064_v46 = vmul.f32 %v2165_v1, %v1954_v34 }
 0x1e9   : > { %1184 = vst [vmem:[%s2569_s4 + $0x18] sm:$0xff] %v1120_v17  ;;  %v1129_v26 = vadd.f32 %v2167_v37, %v1061_v45  ;;  %v1065_v49 = vmul.f32 %v2165_v1, %v1836_v39  ;;  %v1130_v30 = vadd.f32 %v2167_v37, %v1062_v13  ;;  %v1066_v33 = vmul.f32 %v2165_v1, %v1844_v43 }
 0x1ea   : > { %1185 = vst [vmem:[%s2569_s4 + $0x20] sm:$0xff] %v1121_v54  ;;  %v1131_v34 = vadd.f32 %v2167_v37, %v1063_v57  ;;  %v1067_v53 = vmul.f32 %v2165_v1, %v1852_v47  ;;  %v1132_v39 = vadd.f32 %v2167_v37, %v1064_v46  ;;  %v1068_v21 = vmul.f32 %v2165_v1, %v1860_v51 }
 0x1eb   : > { %1186 = vst [vmem:[%s2569_s4 + $0x28] sm:$0xff] %v1122_v62  ;;  %v1133_v43 = vadd.f32 %v2167_v37, %v1065_v49  ;;  %v1069_v9 = vmul.f32 %v2165_v1, %v1868_v55  ;;  %v1134_v47 = vadd.f32 %v2167_v37, %v1066_v33  ;;  %v1070_v32 = vmul.f32 %v2165_v1, %v1876_v59 }
 0x1ec   : > { %1187 = vst [vmem:[%s2569_s4 + $0x30] sm:$0xff] %v1123_v2  ;;  %v1135_v51 = vadd.f32 %v2167_v37, %v1067_v53  ;;  %v1071_v25 = vmul.f32 %v2165_v1, %v1884_v63  ;;  %v1136_v55 = vadd.f32 %v2167_v37, %v1068_v21  ;;  %v1072_v36 = vmul.f32 %v2165_v1, %v1892_v3  ;;  %v2633_v2 = vld [vmem:[#allocation27_spill] sm:$0xff]  ;;  %v2637_v53 = vld [vmem:[#allocation24_spill] sm:$0xff] }
 0x1ed   : > { %1188 = vst [vmem:[%s2569_s4 + $0x38] sm:$0xff] %v1124_v6  ;;  %v1137_v59 = vadd.f32 %v2167_v37, %v1069_v9  ;;  %v1073_v29 = vmul.f32 %v2165_v1, %v1900_v7  ;;  %v1138_v63 = vadd.f32 %v2167_v37, %v1070_v32  ;;  %v1074_v38 = vmul.f32 %v2165_v1, %v1908_v11  ;;  %v2639_v32 = vld [vmem:[#allocation5_spill] sm:$0xff] }
 0x1ee   : > { %1189 = vst [vmem:[%s2569_s4 + $0x40] sm:$0xff] %v1125_v10  ;;  %v1139_v3 = vadd.f32 %v2167_v37, %v1071_v25  ;;  %v1075_v5 = vmul.f32 %v2165_v1, %v1916_v15  ;;  %v1140_v7 = vadd.f32 %v2167_v37, %v1072_v36  ;;  %v1076_v24 = vmul.f32 %v2165_v1, %v1924_v19 }
 0x1ef   : > { %1190 = vst [vmem:[%s2569_s4 + $0x48] sm:$0xff] %v1126_v14  ;;  %v1141_v11 = vadd.f32 %v2167_v37, %v1073_v29  ;;  %v1077_v28 = vmul.f32 %v2165_v1, %v1932_v23  ;;  %v1142_v15 = vadd.f32 %v2167_v37, %v1074_v38  ;;  %v1078_v41 = vmul.f32 %v2165_v1, %v1940_v27  ;;  %v2641_v29 = vld [vmem:[#allocation9_spill] sm:$0xff] }
 0x1f0   : > { %1191 = vst [vmem:[%s2569_s4 + $0x50] sm:$0xff] %v1127_v18  ;;  %v1143_v19 = vadd.f32 %v2167_v37, %v1075_v5  ;;  %v1079_v17 = vmul.f32 %v2165_v1, %v1948_v31  ;;  %v1144_v23 = vadd.f32 %v2167_v37, %v1076_v24  ;;  %v1080_v50 = vmul.f32 %v2165_v1, %v1956_v35  ;;  %v2643_v24 = vld [vmem:[#allocation11_spill] sm:$0xff] }
 0x1f1   : > { %1192 = vst [vmem:[%s2569_s4 + $0x58] sm:$0xff] %v1128_v22  ;;  %v1145_v27 = vadd.f32 %v2167_v37, %v1077_v28  ;;  %v1081_v54 = vmul.f32 %v2165_v1, %v1838_v40  ;;  %v1146_v31 = vadd.f32 %v2167_v37, %v1078_v41  ;;  %v1082_v58 = vmul.f32 %v2165_v1, %v1846_v44  ;;  %v2634_v22 = vld [vmem:[#allocation18_spill] sm:$0xff] }
 0x1f2   : > { %1193 = vst [vmem:[%s2569_s4 + $0x60] sm:$0xff] %v1129_v26  ;;  %v1147_v35 = vadd.f32 %v2167_v37, %v1079_v17  ;;  %v1083_v62 = vmul.f32 %v2165_v1, %v1854_v48  ;;  %v1148_v40 = vadd.f32 %v2167_v37, %v1080_v50  ;;  %v1084_v20 = vmul.f32 %v2165_v1, %v1862_v52  ;;  %v2635_v26 = vld [vmem:[#allocation20_spill] sm:$0xff]  ;;  %v2645_v17 = vld [vmem:[#allocation13_spill] sm:$0xff] }
 0x1f3   : > { %1194 = vst [vmem:[%s2569_s4 + $0x68] sm:$0xff] %v1130_v30  ;;  %v1112_v44 = vmul.f32 %v2165_v1, %v2633_v2  ;;  %v1149_v42 = vadd.f32 %v2167_v37, %v1081_v54  ;;  %v1085_v48 = vmul.f32 %v2165_v1, %v1870_v56  ;;  %v1150_v6 = vadd.f32 %v2167_v37, %v1082_v58  ;;  %v2636_v30 = vld [vmem:[#allocation22_spill] sm:$0xff]  ;;  %v2647_v58 = vld [vmem:[#allocation15_spill] sm:$0xff] }
 0x1f4   : > { %1195 = vst [vmem:[%s2569_s4 + $0x70] sm:$0xff] %v1131_v34  ;;  %v1086_v52 = vmul.f32 %v2165_v1, %v1878_v60  ;;  %v1151_v10 = vadd.f32 %v2167_v37, %v1083_v62  ;;  %v1087_v56 = vmul.f32 %v2165_v1, %v1886_v0  ;;  %v1152_v45 = vadd.f32 %v2167_v37, %v1084_v20 }
 0x1f5   : > { %1196 = vst [vmem:[%s2569_s4 + $0x78] sm:$0xff] %v1132_v39  ;;  %v2372_v61 = vadd.f32 %v2167_v37, %v1112_v44  ;;  %v1088_v60 = vmul.f32 %v2165_v1, %v1894_v4  ;;  %v1153_v14 = vadd.f32 %v2167_v37, %v1085_v48  ;;  %v1089_v13 = vmul.f32 %v2165_v1, %v1902_v8  ;;  %v2649_v44 = vld [vmem:[#allocation17_spill] sm:$0xff] }
 0x1f6   : > { %1197 = vst [vmem:[%s2569_s4 + $0x80] sm:$0xff] %v1133_v43  ;;  %v1154_v0 = vadd.f32 %v2167_v37, %v1086_v52  ;;  %v1090_v18 = vmul.f32 %v2165_v1, %v1910_v12  ;;  %v1155_v4 = vadd.f32 %v2167_v37, %v1087_v56  ;;  %v1091_v57 = vmul.f32 %v2165_v1, %v1918_v16  ;;  %v2638_v43 = vld [vmem:[#allocation26_spill] sm:$0xff]  ;;  %v2651_v56 = vld [vmem:[#allocation21_spill] sm:$0xff] }
 0x1f7   : > { %1198 = vst [vmem:[%s2569_s4 + $0x88] sm:$0xff] %v1134_v47  ;;  %v1156_v8 = vadd.f32 %v2167_v37, %v1088_v60  ;;  %v1092_v46 = vmul.f32 %v2165_v1, %v2634_v22  ;;  %v1157_v12 = vadd.f32 %v2167_v37, %v1089_v13  ;;  %v1093_v49 = vmul.f32 %v2165_v1, %v2635_v26 }
 0x1f8   : > { %1199 = vst [vmem:[%s2569_s4 + $0x90] sm:$0xff] %v1135_v51  ;;  %v1158_v16 = vadd.f32 %v2167_v37, %v1090_v18  ;;  %v1094_v33 = vmul.f32 %v2165_v1, %v2636_v30  ;;  %v1159_v34 = vadd.f32 %v2167_v37, %v1091_v57  ;;  %v1095_v39 = vmul.f32 %v2165_v1, %v2637_v53  ;;  %v2653_v18 = vld [vmem:[#allocation25_spill] sm:$0xff] }
 0x1f9   : > { %1200 = vst [vmem:[%s2569_s4 + $0x98] sm:$0xff] %v1136_v55  ;;  %v1160_v21 = vadd.f32 %v2167_v37, %v1092_v46  ;;  %v1096_v9 = vmul.f32 %v2165_v1, %v2638_v43  ;;  %v1161_v47 = vadd.f32 %v2167_v37, %v1093_v49  ;;  %v1097_v51 = vmul.f32 %v2165_v1, %v2639_v32  ;;  %v2640_v55 = vld [vmem:[#allocation7_spill] sm:$0xff] }
 0x1fa   : > { %1201 = vst [vmem:[%s2569_s4 + $0xa0] sm:$0xff] %v1137_v59  ;;  %v1162_v25 = vadd.f32 %v2167_v37, %v1094_v33  ;;  %v1098_v36 = vmul.f32 %v2165_v1, %v2640_v55  ;;  %v1163_v59 = vadd.f32 %v2167_v37, %v1095_v39 }
 0x1fb   : > { %1202 = vst [vmem:[%s2569_s4 + $0xa8] sm:$0xff] %v1138_v63  ;;  %v1099_v63 = vmul.f32 %v2165_v1, %v2641_v29  ;;  %v1164_v38 = vadd.f32 %v2167_v37, %v1096_v9 }
 0x1fc   : > { %1203 = vst [vmem:[%s2569_s4 + $0xb0] sm:$0xff] %v1139_v3  ;;  %v2642_v3 = vld [vmem:[#allocation10_spill] sm:$0xff]  ;;  %v1166_v28 = vadd.f32 %v2167_v37, %v1098_v36 }
 0x1fd   : > { %1204 = vst [vmem:[%s2569_s4 + $0xb8] sm:$0xff] %v1140_v7  ;;  %v1100_v5 = vmul.f32 %v2165_v1, %v2642_v3  ;;  %v1165_v7 = vadd.f32 %v2167_v37, %v1097_v51 }
 0x1fe   : > { %1205 = vst [vmem:[%s2569_s4 + $0xc0] sm:$0xff] %v1141_v11  ;;  %v1101_v11 = vmul.f32 %v2165_v1, %v2643_v24 }
 0x1ff   : > { %1206 = vst [vmem:[%s2569_s4 + $0xc8] sm:$0xff] %v1142_v15  ;;  %v2644_v15 = vld [vmem:[#allocation12_spill] sm:$0xff]  ;;  %v1168_v50 = vadd.f32 %v2167_v37, %v1100_v5 }
 0x200   : > { %1207 = vst [vmem:[%s2569_s4 + $0xd0] sm:$0xff] %v1143_v19  ;;  %v1102_v41 = vmul.f32 %v2165_v1, %v2644_v15  ;;  %v1167_v19 = vadd.f32 %v2167_v37, %v1099_v63 }
 0x201   : > { %1208 = vst [vmem:[%s2569_s4 + $0xd8] sm:$0xff] %v1144_v23  ;;  %v1103_v23 = vmul.f32 %v2165_v1, %v2645_v17 }
 0x202   : > { %1209 = vst [vmem:[%s2569_s4 + $0xe0] sm:$0xff] %v1145_v27  ;;  %v2646_v27 = vld [vmem:[#allocation14_spill] sm:$0xff]  ;;  %v1170_v62 = vadd.f32 %v2167_v37, %v1102_v41 }
 0x203   : > { %1210 = vst [vmem:[%s2569_s4 + $0xe8] sm:$0xff] %v1146_v31  ;;  %v1104_v54 = vmul.f32 %v2165_v1, %v2646_v27  ;;  %v1169_v31 = vadd.f32 %v2167_v37, %v1101_v11  ;;  %v1171_v2 = vadd.f32 %v2167_v37, %v1103_v23 }
 0x204   : > { %1211 = vst [vmem:[%s2569_s4 + $0xf0] sm:$0xff] %v1147_v35  ;;  %v1105_v35 = vmul.f32 %v2165_v1, %v2647_v58 }
 0x205   : > { %1212 = vst [vmem:[%s2569_s4 + $0xf8] sm:$0xff] %v1148_v40  ;;  %v2648_v40 = vld [vmem:[#allocation16_spill] sm:$0xff]  ;;  %v1172_v48 = vadd.f32 %v2167_v37, %v1104_v54 }
 0x206   : > { %1213 = vst [vmem:[%s2569_s4 + $0x100] sm:$0xff] %v1149_v42  ;;  %v1106_v20 = vmul.f32 %v2165_v1, %v2648_v40  ;;  %v1107_v42 = vmul.f32 %v2165_v1, %v2649_v44 }
 0x207   : > { %1214 = vst [vmem:[%s2569_s4 + $0x108] sm:$0xff] %v1150_v6  ;;  %v2650_v6 = vld [vmem:[#allocation19_spill] sm:$0xff] }
 0x208   : > { %1215 = vst [vmem:[%s2569_s4 + $0x110] sm:$0xff] %v1151_v10  ;;  %v1108_v52 = vmul.f32 %v2165_v1, %v2650_v6  ;;  %v1173_v10 = vadd.f32 %v2167_v37, %v1105_v35  ;;  %v1174_v60 = vadd.f32 %v2167_v37, %v1106_v20 }
 0x209   : > { %1216 = vst [vmem:[%s2569_s4 + $0x118] sm:$0xff] %v1152_v45  ;;  %v1109_v45 = vmul.f32 %v2165_v1, %v2651_v56 }
 0x20a   : > { %1217 = vst [vmem:[%s2569_s4 + $0x120] sm:$0xff] %v1153_v14  ;;  %v2652_v14 = vld [vmem:[#allocation23_spill] sm:$0xff]  ;;  %v1176_v57 = vadd.f32 %v2167_v37, %v1108_v52 }
 0x20b   : > { %1218 = vst [vmem:[%s2569_s4 + $0x128] sm:$0xff] %v1154_v0  ;;  %v1110_v13 = vmul.f32 %v2165_v1, %v2652_v14  ;;  %v1175_v0 = vadd.f32 %v2167_v37, %v1107_v42 }
 0x20c   : > { %1219 = vst [vmem:[%s2569_s4 + $0x130] sm:$0xff] %v1155_v4  ;;  %v1111_v4 = vmul.f32 %v2165_v1, %v2653_v18 }
 0x20d   : > { %1220 = vst [vmem:[%s2569_s4 + $0x138] sm:$0xff] %v1156_v8  ;;  %v1177_v8 = vadd.f32 %v2167_v37, %v1109_v45  ;;  %v1178_v22 = vadd.f32 %v2167_v37, %v1110_v13 }
 0x20e   : > { %1221 = vst [vmem:[%s2569_s4 + $0x140] sm:$0xff] %v1157_v12  ;;  %v1179_v1 = vadd.f32 %v2167_v37, %v1111_v4 }
 0x20f   : > { %1222 = vst [vmem:[%s2569_s4 + $0x148] sm:$0xff] %v1158_v16 }
 0x210   : > { %1223 = vst [vmem:[%s2569_s4 + $0x150] sm:$0xff] %v1159_v34 }
 0x211   : > { %1224 = vst [vmem:[%s2569_s4 + $0x158] sm:$0xff] %v1160_v21 }
 0x212   : > { %1225 = vst [vmem:[%s2569_s4 + $0x160] sm:$0xff] %v1161_v47 }
 0x213   : > { %1226 = vst [vmem:[%s2569_s4 + $0x168] sm:$0xff] %v1162_v25 }
 0x214   : > { %1227 = vst [vmem:[%s2569_s4 + $0x170] sm:$0xff] %v1163_v59 }
 0x215   : > { %1228 = vst [vmem:[%s2569_s4 + $0x178] sm:$0xff] %v1164_v38 }
 0x216   : > { %1229 = vst [vmem:[%s2569_s4 + $0x180] sm:$0xff] %v1165_v7 }
 0x217   : > { %1230 = vst [vmem:[%s2569_s4 + $0x188] sm:$0xff] %v1166_v28 }
 0x218   : > { %1231 = vst [vmem:[%s2569_s4 + $0x190] sm:$0xff] %v1167_v19 }
 0x219   : > { %1232 = vst [vmem:[%s2569_s4 + $0x198] sm:$0xff] %v1168_v50 }
 0x21a   : > { %1233 = vst [vmem:[%s2569_s4 + $0x1a0] sm:$0xff] %v1169_v31 }
 0x21b   : > { %1234 = vst [vmem:[%s2569_s4 + $0x1a8] sm:$0xff] %v1170_v62 }
 0x21c   : > { %1235 = vst [vmem:[%s2569_s4 + $0x1b0] sm:$0xff] %v1171_v2 }
 0x21d   : > { %1236 = vst [vmem:[%s2569_s4 + $0x1b8] sm:$0xff] %v1172_v48 }
 0x21e   : > { %1237 = vst [vmem:[%s2569_s4 + $0x1c0] sm:$0xff] %v1173_v10 }
 0x21f   : > { %1238 = vst [vmem:[%s2569_s4 + $0x1c8] sm:$0xff] %v1174_v60 }
 0x220   : > { %1239 = vst [vmem:[%s2569_s4 + $0x1d0] sm:$0xff] %v1175_v0 }
 0x221   : > { %1240 = vst [vmem:[%s2569_s4 + $0x1d8] sm:$0xff] %v1176_v57 }
 0x222   : > { %1241 = vst [vmem:[%s2569_s4 + $0x1e0] sm:$0xff] %v1177_v8 }
 0x223   : > { %1242 = vst [vmem:[%s2569_s4 + $0x1e8] sm:$0xff] %v1178_v22 }
 0x224   : > { %1243 = vst [vmem:[%s2569_s4 + $0x1f0] sm:$0xff] %v1179_v1 }
 0x225   : > { %1244 = vst [vmem:[%s2569_s4 + $0x1f8] sm:$0xff] %v2372_v61 }
 0x226 PF: > { %s14_s17 = sadd.s32 1, %s1648_s17   ;;  %s2654_s15 = smov %s1644_s16 }
 0x227   : > { %p11_p8 = scmp.ge.s32.totalorder %s14_s17, 4   ;;  %s2655_s16 = smov %s2657_s18 }
 0x229   :  { %13 = sbr.rel (!%p11_p8) target bundleno = 2 (0x2), region = 91 }

</bundles_post_ra>
